<compile_context>
chip_gen: v7x
topology: tpu7x:2x2x1
jax: 0.10.0
libtpu: 0.0.40
codegen_flags: <defaults>
</compile_context>

<pallas_src>
import jax
import jax.numpy as jnp
from jax.experimental import pallas as pl
from jax.experimental.pallas import tpu as pltpu


# ---------------------------------------------------------------------------
# Kernel
# ---------------------------------------------------------------------------
def _scale_kernel(scalar_ref, x_ref, o_ref):
    # scalar_ref lives in SMEM as a (1, 1) array; broadcast-multiply the tile.
    o_ref[...] = x_ref[...] * scalar_ref[0, 0]


# ---------------------------------------------------------------------------
# Chip-/layout-aware sizing
# ---------------------------------------------------------------------------
_LANE = 128
_WIDE_LANES = 1024  # lane-dense width for the flattened (repacked) view


def _round_up(x: int, m: int) -> int:
    return ((x + m - 1) // m) * m


def _sublane_count(dtype) -> int:
    # Sublane packing: 8 rows for 4-byte dtypes, 16 for 2-byte, 32 for 1-byte.
    return max(8, 32 // jnp.dtype(dtype).itemsize)


def _chip_config():
    """Returns (target_block_bytes, vmem_limit_bytes, small_input_bytes, num_tc)."""
    kind = ""
    try:
        kind = jax.devices()[0].device_kind.lower()
    except Exception:
        pass
    if "v7" in kind:
        # 64 MiB physical VMEM, 2 TensorCores/chip, ~3.2 TB/s HBM.
        # 4 double-buffered blocks at 6 MiB = 24 MiB, well under 48 MiB cap.
        return 6 << 20, 48 << 20, 4 << 20, 2
    if "v6" in kind:
        # 128 MiB physical VMEM, 1 TC, ~1.4 TB/s HBM: big blocks, few steps.
        return 16 << 20, 96 << 20, 2 << 20, 1
    if "v5" in kind or "v4" in kind:
        # 128 MiB physical VMEM, 1 TC. Scoped VMEM default is only 16 MiB, so
        # the explicit vmem_limit_bytes below is load-bearing here.
        return 16 << 20, 96 << 20, 1 << 20, 1
    # Unknown / future chip: conservative, v7x-safe settings.
    return 4 << 20, 32 << 20, 1 << 20, 2


def _pick_tile_b(B: int, N: int, dtype, target_block_bytes: int, num_tc: int) -> int:
    """Batch-tile size: largest sublane-aligned block within the VMEM budget,
    balanced to an even grid-step count on multi-TensorCore chips."""
    itemsize = jnp.dtype(dtype).itemsize
    sub = _sublane_count(dtype)
    row_bytes = max(1, N * itemsize)
    tile_b = max(sub, (target_block_bytes // row_bytes) // sub * sub)

    if num_tc > 1 and B >= 2 * sub:
        # v7x megacore: grid-step count a multiple of num_tc with near-equal
        # tiles so both TensorCores stream the same number of bytes.
        steps = pl.cdiv(B, tile_b)
        steps = _round_up(max(steps, num_tc), num_tc)
        tile_b = max(sub, _round_up(pl.cdiv(B, steps), sub))
        # Sublane rounding can collapse the step count below a multiple of
        # num_tc; shrink (best effort) until balanced again.
        while tile_b > sub and pl.cdiv(B, tile_b) % num_tc != 0:
            tile_b -= sub

    # A block may not exceed the array extent unless it spans the full axis;
    # tile_b == B (full axis) is always a legal block shape.
    if tile_b > B:
        tile_b = B
    return tile_b


# ---------------------------------------------------------------------------
# Wrapper
# ---------------------------------------------------------------------------
def scale_forward(x: jax.Array, scalar: jax.Array, *,
                  force_pallas: bool = False,
                  donate: bool = False) -> jax.Array:
    """Elementwise x * scalar. Accepts any-rank x; scalar must be 0-dim.

    donate=True aliases x's buffer to the output (pair with donate_argnums /
    jax.jit donation at the caller when the original x is no longer needed).
    """
    assert scalar.ndim == 0
    target_block, vmem_limit, small_bytes, num_tc = _chip_config()
    itemsize = jnp.dtype(x.dtype).itemsize
    nbytes = x.size * itemsize

    # Tiny inputs: pallas_call launch + pipeline setup dwarfs the multiply —
    # let XLA fuse it. Threshold scales with each generation's HBM bandwidth.
    if not force_pallas and nbytes < small_bytes:
        return x * scalar.astype(x.dtype)

    # 0-dim scalar -> (1, 1) SMEM-resident operand (cast matches torch's
    # same-dtype elementwise broadcast semantics).
    scalar_2d = scalar.astype(x.dtype).reshape(1, 1)

    sub = _sublane_count(x.dtype)
    lane_friendly = (
        x.ndim == 2
        and x.shape[-1] % _LANE == 0
        and x.shape[-1] * itemsize * sub <= target_block
    )

    if lane_friendly:
        x2d = x
        pad = 0
    else:
        # Lane-dense repack: view the flat element stream as (rows, 1024) so
        # every store is a full-width unmasked vst. Pure layout plumbing —
        # elementwise scale is layout-agnostic.
        total = x.size
        rows = pl.cdiv(total, _WIDE_LANES)
        pad = rows * _WIDE_LANES - total
        flat = x.reshape(-1)
        if pad:
            flat = jnp.pad(flat, (0, pad))
        x2d = flat.reshape(rows, _WIDE_LANES)

    B2, N2 = x2d.shape
    tile_b = _pick_tile_b(B2, N2, x.dtype, target_block, num_tc)
    grid = (pl.cdiv(B2, tile_b),)

    out2d = pl.pallas_call(
        _scale_kernel,
        out_shape=jax.ShapeDtypeStruct((B2, N2), x.dtype),
        grid_spec=pl.GridSpec(
            grid=grid,
            in_specs=[
                pl.BlockSpec(memory_space=pltpu.SMEM),          # scalar, untiled
                pl.BlockSpec((tile_b, N2), lambda i: (i, 0)),   # x tile (lane-dense)
            ],
            out_specs=pl.BlockSpec((tile_b, N2), lambda i: (i, 0)),
        ),
        compiler_params=pltpu.CompilerParams(
            dimension_semantics=("parallel",),
            vmem_limit_bytes=vmem_limit,
        ),
        input_output_aliases=({1: 0} if donate else {}),
    )(scalar_2d, x2d)

    if lane_friendly:
        return out2d
    out_flat = out2d.reshape(-1)
    if pad:
        out_flat = out_flat[: x.size]
    return out_flat.reshape(x.shape)


def compute_jacobian(forwards: jax.Array, scalar: jax.Array) -> jax.Array:
    """Pure-JAX glue mirroring Scale.compute_jacobian: (B, n, n) scaled identity.
    Scale the n x n identity first, then broadcast-write (B·n² -> n² multiplies)."""
    batch_n, n = forwards.shape[0], forwards.shape[1]
    eye_scaled = jnp.eye(n, dtype=forwards.dtype) * scalar.astype(forwards.dtype)
    return jnp.broadcast_to(eye_scaled, (batch_n, n, n))


# ---------------------------------------------------------------------------
# Demo / correctness check
# ---------------------------------------------------------------------------
if __name__ == "__main__":
    key = jax.random.PRNGKey(0)
    k1, k2, k3, k4, k5 = jax.random.split(key, 5)

    # Deterministic "parameter": the 0-dim scalar from Scale.__init__
    scalar = jnp.asarray(2.5, dtype=jnp.float32)

    # 1) Small lane-friendly input consistent with forward/compute_jacobian.
    B, N = 8, 128
    x = jax.random.normal(k1, (B, N), dtype=jnp.float32)
    out = jax.block_until_ready(scale_forward(x, scalar, force_pallas=True))
    ref = x * scalar
    assert out.shape == ref.shape and out.dtype == ref.dtype
    assert jnp.allclose(out, ref, atol=1e-6, rtol=1e-6)

    # 2) Batch not divisible by the tile: cdiv grid + masked tail (and even
    #    step balancing on multi-TC chips).
    x2 = jax.random.normal(k2, (1000, 128), dtype=jnp.float32)
    out2 = jax.block_until_ready(scale_forward(x2, scalar, force_pallas=True))
    assert jnp.allclose(out2, x2 * scalar, atol=1e-6, rtol=1e-6)

    # 3) Odd feature dim (n << 128): exercises the lane-dense (rows, 1024)
    #    repack path with padding.
    x3 = jax.random.normal(k3, (37, 50), dtype=jnp.float32)
    out3 = jax.block_until_ready(scale_forward(x3, scalar, force_pallas=True))
    assert out3.shape == x3.shape
    assert jnp.allclose(out3, x3 * scalar, atol=1e-6, rtol=1e-6)

    # 4) Higher-rank input (elementwise forward is rank-agnostic) via repack.
    x4 = jax.random.normal(k4, (2, 4, 16, 16), dtype=jnp.float32)
    out4 = jax.block_until_ready(scale_forward(x4, scalar, force_pallas=True))
    assert out4.shape == x4.shape
    assert jnp.allclose(out4, x4 * scalar, atol=1e-6, rtol=1e-6)

    # 5) Donated-input path: alias x to the output under jit donation.
    x5 = jax.random.normal(k5, (256, 256), dtype=jnp.float32)
    ref5 = x5 * scalar
    scale_donating = jax.jit(
        lambda a, s: scale_forward(a, s, force_pallas=True, donate=True),
        donate_argnums=(0,),
    )
    out5 = jax.block_until_ready(scale_donating(x5, scalar))
    assert jnp.allclose(out5, ref5, atol=1e-6, rtol=1e-6)
    # (x5 is donated above; do not use it afterwards.)

    # 6) Small-input fast path (pure XLA fusion) stays numerically identical.
    out_small = jax.block_until_ready(scale_forward(x, scalar))
    assert jnp.allclose(out_small, ref, atol=1e-6, rtol=1e-6)

    # 7) Non-kernel jacobian helper for parity with the module.
    jac = jax.block_until_ready(compute_jacobian(x, scalar))
    assert jac.shape == (B, N, N)
    assert jnp.allclose(jac[0], jnp.eye(N, dtype=jnp.float32) * 2.5)

    print("KERNEL_OK")
</pallas_src>

<mosaic_0001>
module attributes {stable_mosaic.version = 11 : i64} {
  func.func @_scale_kernel(%arg0: i32, %arg1: memref<1x1xf32, #tpu.memory_space<smem>>, %arg2: memref<8x128xf32, #tpu.memory_space<vmem>>, %arg3: memref<8x128xf32, #tpu.memory_space<vmem>>) attributes {dimension_semantics = [#tpu.dimension_semantics<parallel>], iteration_bounds = array<i64: 1>, scalar_prefetch = 0 : i64, scratch_operands = 0 : i64, tpu.core_type = #tpu.core_type<tc>, window_params = [{transform_indices = @transform_0, window_bounds = array<i64: 1, 1>}, {transform_indices = @transform_1, window_bounds = array<i64: 8, 128>}, {transform_indices = @transform_2, window_bounds = array<i64: 8, 128>}]} {
    %c0 = arith.constant 0 : index
    %c0_0 = arith.constant 0 : index
    %0 = vector.load %arg2[%c0, %c0_0] : memref<8x128xf32, #tpu.memory_space<vmem>>, vector<8x128xf32>
    %c0_1 = arith.constant 0 : index
    %c0_2 = arith.constant 0 : index
    %1 = memref.load %arg1[%c0_1, %c0_2] : memref<1x1xf32, #tpu.memory_space<smem>>
    %2 = vector.broadcast %1 : f32 to vector<8x128xf32>
    %3 = arith.mulf %0, %2 : vector<8x128xf32>
    %c0_3 = arith.constant 0 : index
    %c0_4 = arith.constant 0 : index
    %4 = vector.load %arg3[%c0_3, %c0_4] : memref<8x128xf32, #tpu.memory_space<vmem>>, vector<8x128xf32>
    tpu.vector_store %arg3[%c0_3, %c0_4], %3 {strides = array<i32>} : memref<8x128xf32, #tpu.memory_space<vmem>>, vector<8x128xf32>,
    return
  }
  func.func @transform_0(%arg0: i32) -> (i32, i32) {
    %c0_i32 = arith.constant 0 : i32
    %c0_i32_0 = arith.constant 0 : i32
    %c0_i32_1 = arith.constant 0 : i32
    return %c0_i32, %c0_i32_0 : i32, i32
  }
  func.func @transform_1(%arg0: i32) -> (i32, i32) {
    %c0_i32 = arith.constant 0 : i32
    %c0_i32_0 = arith.constant 0 : i32
    return %arg0, %c0_i32 : i32, i32
  }
  func.func @transform_2(%arg0: i32) -> (i32, i32) {
    %c0_i32 = arith.constant 0 : i32
    %c0_i32_0 = arith.constant 0 : i32
    return %arg0, %c0_i32 : i32, i32
  }
}

</mosaic_0001>

<bundles_post_ra>
// kernel: tpu_custom_call.1
= control target key start
LH: loop header
LB: loop body
LE: loop exit
PB: predicated region body
PF: predicated region fallthrough
CT: control target
= control target key end

     0   :  { %8 = vsyncpa [#allocation4], 0  ;;  %s139_s0 = inlined_call_operand.<no memory space> [shape: f32[1,1], index: 0, kind: input, shape index: {}]   ;;  %s140_s1 = inlined_call_operand.hbm [shape: f32[8,128], index: 1, kind: input, shape index: {}]   ;;  %s141_s2 = inlined_call_operand.hbm [shape: f32[8,128], index: 2, kind: output, shape index: {}]  }
   0x1   :  { %9 = vsyncpa [#allocation5], 0  ;;  %s95_s9 = smov [#allocation3]   ;;  %s47_s13 = scalar_lea.hbm %s140_s1, 128 }
   0x2   :  { %s18_s10 = sshll.u32 %s95_s9, 4  ;;  %p48_p0 = scmp.ne.s32.totalorder %s140_s1, %s47_s13  ;;  %s19_s10 = int_to_ptr.vmem [resolvable:$true] %s18_s10 }
   0x3   :  { %p51_p1 = scmp.lt.u32.totalorder %s47_s13, %s140_s1 }
   0x5   :  { %p53_p2 = pnand %p51_p1, %p48_p0 }
   0x7   :  { %56 = shalt.err (!%p53_p2)
}
   0x8   :  { %s57_s18 = scalar_lea.vmem %s19_s10, 128  ;;  %p62_p4 = scmp.lt.s32.totalorder %s19_s10, %s19_s10 }
   0x9   :  { %p58_p3 = scmp.ne.s32.totalorder %s19_s10, %s57_s18  ;;  %p63_p5 = scmp.lt.s32.totalorder %s57_s18, %s57_s18 }
   0xb   :  { %p64_p6 = por %p63_p5, %p62_p4 }
   0xd   :  { %p65_p7 = pnand %p64_p6, %p58_p3 }
   0xf   :  { %68 = shalt.err (!%p65_p7)
}
  0x10   :  { %21 = dma.hbm_to_vmem [thread:$0]  %s140_s1, 128, %s19_s10, [#allocation4]  }
  0x11   :  { %91 = dma.done.wait [#allocation4], 128  }
  0x12   :  { %92 = vsyncadd [#allocation4], 4294967168  ;;  %v27_v0 = vstv %s139_s0  ;;  %s96_s23 = smov [#allocation6]   ;;  %v25_v1 = vld [vmem:[#allocation3] sm:$0xff] }
  0x13   :  { %s36_s24 = sshll.u32 %s96_s23, 4  ;;  %v28_v2 = vmul.f32 %v27_v0, %v25_v1  ;;  %s37_s24 = int_to_ptr.vmem [resolvable:$true] %s36_s24 }
  0x14   :  { %s69_s25 = scalar_lea.vmem %s37_s24, 128  ;;  %p74_p9 = scmp.lt.s32.totalorder %s37_s24, %s37_s24 }
  0x15   :  { %29 = vst [vmem:[#allocation6] sm:$0xff] %v28_v2  ;;  %p70_p8 = scmp.ne.s32.totalorder %s37_s24, %s69_s25  ;;  %p75_p10 = scmp.lt.s32.totalorder %s69_s25, %s69_s25 }
  0x17   :  { %p76_p11 = por %p75_p10, %p74_p9 }
  0x19   :  { %p77_p12 = pnand %p76_p11, %p70_p8 }
  0x1b   :  { %80 = shalt.err (!%p77_p12)
}
  0x1c   :  { %s81_s27 = scalar_lea.hbm %s141_s2, 128 }
  0x1d   :  { %p82_p13 = scmp.ne.s32.totalorder %s141_s2, %s81_s27  ;;  %p85_p0 = scmp.lt.u32.totalorder %s81_s27, %s141_s2 }
  0x1f   :  { %p87_p1 = pnand %p85_p0, %p82_p13 }
  0x21   :  { %90 = shalt.err (!%p87_p1)
}
  0x22   :  { %39 = dma.vmem_to_hbm [thread:$0]  %s37_s24, 128, %s141_s2, [#allocation5]  }
  0x23   :  { %93 = dma.done.wait [#allocation5], 128  }
  0x24   :  { %94 = vsyncadd [#allocation5], 4294967168 }
  0x25   :  { %43 = vsyncpa [#allocation4], 1 }
  0x26   :  { %44 = vsyncpa [#allocation5], 1 }

</bundles_post_ra>
